<compile_context>
chip_gen: v7x
topology: tpu7x:2x2x1
jax: 0.10.0
libtpu: 0.0.40
codegen_flags: <defaults>
</compile_context>

<pallas_src>
import jax
import jax.numpy as jnp
from jax.experimental import pallas as pl
from jax.experimental.pallas import tpu as pltpu


def _normalize_kernel(x_ref, mean_ref, scale_ref, o_ref):
    # x_ref:     (block_rows, block_cols)
    # mean_ref:  (block_rows, 1)  f32 per-row mean
    # scale_ref: (block_rows, 1)  f32 per-row 1/std
    x = x_ref[...].astype(jnp.float32)
    o_ref[...] = ((x - mean_ref[...]) * scale_ref[...]).astype(o_ref.dtype)


def _round_up(x, m):
    return ((x + m - 1) // m) * m


def _round_down(x, m):
    return (x // m) * m


def _sublane_align(dtype):
    size = jnp.dtype(dtype).itemsize
    if size >= 4:
        return 8
    if size == 2:
        return 16
    return 32


def _chip_block_target():
    """Per-generation (target_block_bytes, vmem_limit_cap_bytes)."""
    try:
        kind = jax.devices()[0].device_kind.lower()
    except Exception:  # pragma: no cover - defensive
        kind = ""
    if "v5 lite" in kind or "v5e" in kind or "v5lite" in kind:
        # v5e: lowest HBM BW, 16 MiB default scoped VMEM -> 2 MiB blocks.
        return 2 * 1024 * 1024, 40 * 1024 * 1024
    # v6e / v7x / other: higher HBM BW makes the ~0.35us step overhead
    # relatively larger -> 4 MiB blocks (double-buffered footprint ~16 MiB).
    return 4 * 1024 * 1024, 40 * 1024 * 1024


def _choose_blocks(R, L, itemsize, target_bytes, sublane):
    # Rows: prefer the whole (typically tiny, = N*C) row dim; tile only if big.
    if R <= 1024:
        block_rows = R  # full dim is always a legal block size
    else:
        block_rows = _round_down(min(R, 1024), sublane)

    # Cols: lane-dense, multiple of 128, sized to hit the per-block byte
    # target.  Partial (ragged) edge blocks are fine: Pallas masks them.
    desired_cols = max(128, target_bytes // max(1, block_rows * itemsize))
    if L % 128 == 0:
        block_cols = min(L, _round_down(desired_cols, 128))
    elif desired_cols >= L:
        block_cols = L  # full last dim (legal even if unaligned)
    else:
        block_cols = max(128, _round_down(desired_cols, 128))

    # Guarantee enough grid steps for double-buffered overlap (and the 2-TC
    # split on v7x) once the array is big enough for it to matter.
    MIN_STEPS = 8
    if R * L * itemsize >= 2 * 1024 * 1024:
        def steps(br, bc):
            return pl.cdiv(R, br) * pl.cdiv(L, bc)

        while steps(block_rows, block_cols) < MIN_STEPS:
            if block_cols >= 256:
                block_cols = _round_down(block_cols // 2, 128)
            elif block_rows >= 2 * sublane and block_rows % sublane == 0:
                block_rows = _round_down(block_rows // 2, sublane)
            elif block_rows == R and R >= 2 * sublane:
                block_rows = _round_down(R // 2, sublane)
            else:
                break

    return block_rows, block_cols


def normalize(x, mean, std):
    """Pallas TPU implementation of Normalize.forward.

    x:    (N, C, H, W) float array
    mean: (C,) float array
    std:  (C,) float array
    """
    N, C, H, W = x.shape
    R, L = N * C, H * W
    out_dtype = x.dtype
    itemsize = jnp.dtype(out_dtype).itemsize

    # Per-channel -> per-row affine params in f32.  Row r = n*C + c -> c = r%C.
    mean_f32 = jnp.asarray(mean, dtype=jnp.float32).reshape(C)
    inv_std_f32 = 1.0 / jnp.asarray(std, dtype=jnp.float32).reshape(C)
    mean_rows = jnp.tile(mean_f32, N).reshape(R, 1)
    scale_rows = jnp.tile(inv_std_f32, N).reshape(R, 1)

    # Free reshape (contiguous NCHW) to a lane-dense 2D layout.
    x2 = x.reshape(R, L)

    target_bytes, vmem_cap = _chip_block_target()
    sublane = _sublane_align(out_dtype)
    block_rows, block_cols = _choose_blocks(R, L, itemsize, target_bytes, sublane)

    grid = (pl.cdiv(R, block_rows), pl.cdiv(L, block_cols))

    # Scoped-VMEM limit sized to the real double-buffered footprint
    # (2x input block + 2x output block + param tiles), with headroom.
    block_bytes = block_rows * block_cols * itemsize
    param_bytes = 4 * _round_up(block_rows, 8) * 128 * 4  # 2 params x 2 bufs, padded
    footprint = 4 * block_bytes + param_bytes + (1 << 20)
    vmem_limit = int(min(max(footprint * 3 // 2, 16 * 1024 * 1024), vmem_cap))

    out2 = pl.pallas_call(
        _normalize_kernel,
        out_shape=jax.ShapeDtypeStruct((R, L), out_dtype),
        grid=grid,
        in_specs=[
            pl.BlockSpec((block_rows, block_cols), lambda i, j: (i, j)),
            pl.BlockSpec((block_rows, 1), lambda i, j: (i, 0)),  # per-row mean
            pl.BlockSpec((block_rows, 1), lambda i, j: (i, 0)),  # per-row 1/std
        ],
        out_specs=pl.BlockSpec((block_rows, block_cols), lambda i, j: (i, j)),
        compiler_params=pltpu.CompilerParams(
            dimension_semantics=("parallel", "parallel"),
            vmem_limit_bytes=vmem_limit,
        ),
    )(x2, mean_rows, scale_rows)

    return out2.reshape(N, C, H, W)


if __name__ == "__main__":
    key = jax.random.PRNGKey(0)
    N, C, H, W = 2, 4, 16, 16

    kx, _ = jax.random.split(key)
    x = jax.random.normal(kx, (N, C, H, W), dtype=jnp.float32)

    # Deterministic "module parameters" (ImageNet-style per-channel stats).
    mean = jnp.array([0.485, 0.456, 0.406, 0.5][:C], dtype=jnp.float32)
    std = jnp.array([0.229, 0.224, 0.225, 0.25][:C], dtype=jnp.float32)

    out = jax.block_until_ready(normalize(x, mean, std))

    # Reference check in plain JAX (PyTorch semantics).
    ref = (x - mean[None, :, None, None]) / std[None, :, None, None]
    assert out.shape == ref.shape and out.dtype == ref.dtype
    assert jnp.allclose(out, ref, atol=1e-6, rtol=1e-6)

    print("KERNEL_OK")
</pallas_src>

<mosaic_0001>
module attributes {stable_mosaic.version = 11 : i64} {
  func.func @_normalize_kernel(%arg0: i32, %arg1: i32, %arg2: memref<8x256xf32, #tpu.memory_space<vmem>>, %arg3: memref<8x1xf32, #tpu.memory_space<vmem>>, %arg4: memref<8x1xf32, #tpu.memory_space<vmem>>, %arg5: memref<8x256xf32, #tpu.memory_space<vmem>>) attributes {dimension_semantics = [#tpu.dimension_semantics<parallel>, #tpu.dimension_semantics<parallel>], iteration_bounds = array<i64: 1, 1>, scalar_prefetch = 0 : i64, scratch_operands = 0 : i64, tpu.core_type = #tpu.core_type<tc>, window_params = [{transform_indices = @transform_0, window_bounds = array<i64: 8, 256>}, {transform_indices = @transform_1, window_bounds = array<i64: 8, 1>}, {transform_indices = @transform_2, window_bounds = array<i64: 8, 1>}, {transform_indices = @transform_3, window_bounds = array<i64: 8, 256>}]} {
    %c0 = arith.constant 0 : index
    %c0_0 = arith.constant 0 : index
    %0 = vector.load %arg2[%c0, %c0_0] : memref<8x256xf32, #tpu.memory_space<vmem>>, vector<8x256xf32>
    %c0_1 = arith.constant 0 : index
    %c0_2 = arith.constant 0 : index
    %1 = vector.load %arg3[%c0_1, %c0_2] : memref<8x1xf32, #tpu.memory_space<vmem>>, vector<8x1xf32>
    %2 = vector.broadcast %1 : vector<8x1xf32> to vector<8x256xf32>
    %3 = arith.subf %0, %2 : vector<8x256xf32>
    %c0_3 = arith.constant 0 : index
    %c0_4 = arith.constant 0 : index
    %4 = vector.load %arg4[%c0_3, %c0_4] : memref<8x1xf32, #tpu.memory_space<vmem>>, vector<8x1xf32>
    %5 = vector.broadcast %4 : vector<8x1xf32> to vector<8x256xf32>
    %6 = arith.mulf %3, %5 : vector<8x256xf32>
    %c0_5 = arith.constant 0 : index
    %c0_6 = arith.constant 0 : index
    %7 = vector.load %arg5[%c0_5, %c0_6] : memref<8x256xf32, #tpu.memory_space<vmem>>, vector<8x256xf32>
    tpu.vector_store %arg5[%c0_5, %c0_6], %6 {strides = array<i32>} : memref<8x256xf32, #tpu.memory_space<vmem>>, vector<8x256xf32>,
    return
  }
  func.func @transform_0(%arg0: i32, %arg1: i32) -> (i32, i32) {
    %c0_i32 = arith.constant 0 : i32
    return %arg0, %arg1 : i32, i32
  }
  func.func @transform_1(%arg0: i32, %arg1: i32) -> (i32, i32) {
    %c0_i32 = arith.constant 0 : i32
    %c0_i32_0 = arith.constant 0 : i32
    return %arg0, %c0_i32 : i32, i32
  }
  func.func @transform_2(%arg0: i32, %arg1: i32) -> (i32, i32) {
    %c0_i32 = arith.constant 0 : i32
    %c0_i32_0 = arith.constant 0 : i32
    return %arg0, %c0_i32 : i32, i32
  }
  func.func @transform_3(%arg0: i32, %arg1: i32) -> (i32, i32) {
    %c0_i32 = arith.constant 0 : i32
    return %arg0, %arg1 : i32, i32
  }
}

</mosaic_0001>

<bundles_post_ra>
// kernel: tpu_custom_call.1
= control target key start
LH: loop header
LB: loop body
LE: loop exit
PB: predicated region body
PF: predicated region fallthrough
CT: control target
= control target key end

     0   :  { %s122_s0 = inlined_call_operand.vmem [shape: f32[8,256], index: 0, kind: input, shape index: {}]   ;;  %s123_s1 = inlined_call_operand.vmem [shape: f32[8,1], index: 1, kind: input, shape index: {}]   ;;  %s124_s2 = inlined_call_operand.vmem [shape: f32[8,1], index: 2, kind: input, shape index: {}]   ;;  %s125_s3 = inlined_call_operand.hbm [shape: f32[8,256], index: 3, kind: output, shape index: {}]  }
   0x1   :  { %v17_v0 = vld [vmem:[%s123_s1] sm:$0xff] }
   0x2   :  { %8 = vsyncpa [#allocation3], 0  ;;  %v76_v1 = vmov 0   ;;  %v25_v2 = vld [vmem:[%s124_s2] sm:$0xff]  ;;  %v16_v5 = vld [vmem:[%s122_s0 + $0x8] sm:$0xff]  ;;  %s77_s20 = smov [#allocation2]  }
   0x3   :  { %51 = vset.pattern.permute.xlu0 %v76_v1  ;;  %v15_v4 = vld [vmem:[%s122_s0] sm:$0xff]  ;;  %s41_s1 = sshll.u32 %s77_s20, 4  ;;  %s42_s1 = int_to_ptr.vmem [resolvable:$true] %s41_s1 }
   0x4   :  { %20 = vperm.xlu0 %51, %v17_v0   ;;  %s52_s2 = scalar_lea.vmem %s42_s1, 256  ;;  %p57_p1 = scmp.lt.s32.totalorder %s42_s1, %s42_s1 }
   0x5   :  { %p53_p0 = scmp.ne.s32.totalorder %s42_s1, %s52_s2  ;;  %p58_p2 = scmp.lt.s32.totalorder %s52_s2, %s52_s2 }
   0x7   :  { %p59_p3 = por %p58_p2, %p57_p1 }
   0x8   :  { %28 = vperm.xlu0 %51, %v25_v2  }
   0x9   :  { %p60_p4 = pnand %p59_p3, %p53_p0 }
  0x83   :  { %v21_v3 = vpop.permute.xlu0 %20 }
  0x84   :  { %v23_v6 = vsub.f32 %v15_v4, %v21_v3  ;;  %v24_v7 = vsub.f32 %v16_v5, %v21_v3 }
  0x87   :  { %v29_v8 = vpop.permute.xlu0 %28 }
  0x88   :  { %v31_v9 = vmul.f32 %v29_v8, %v23_v6  ;;  %v32_v10 = vmul.f32 %v29_v8, %v24_v7 }
  0x8a   :  { %33 = vst [vmem:[#allocation2] sm:$0xff] %v31_v9  ;;  %34 = vst [vmem:[#allocation2 + $0x8] sm:$0xff] %v32_v10 }
  0x8b   :  { %63 = shalt.err (!%p60_p4)
}
  0x8c   :  { %s64_s0 = scalar_lea.hbm %s125_s3, 256 }
  0x8d   :  { %p65_p5 = scmp.ne.s32.totalorder %s125_s3, %s64_s0  ;;  %p68_p6 = scmp.lt.u32.totalorder %s64_s0, %s125_s3 }
  0x8f   :  { %p70_p7 = pnand %p68_p6, %p65_p5 }
  0x91   :  { %73 = shalt.err (!%p70_p7)
}
  0x92   :  { %44 = dma.vmem_to_hbm [thread:$0]  %s42_s1, 256, %s125_s3, [#allocation3]  }
  0x93   :  { %74 = dma.done.wait [#allocation3], 256  }
  0x94   :  { %75 = vsyncadd [#allocation3], 4294967040 }
  0x95   :  { %48 = vsyncpa [#allocation3], 1 }

</bundles_post_ra>
